<compile_context>
chip_gen: v5e
topology: v5e:2x2
jax: 0.10.0
libtpu: 0.0.40
codegen_flags: <defaults>
</compile_context>

<pallas_src>
import jax
import jax.numpy as jnp
from jax.experimental import pallas as pl
from jax.experimental.pallas import tpu as pltpu


def _outconv_kernel(x_ref, w_ref, b_ref, o_ref):
    # x_ref: (C_in, T)   pixels lane-dense on the last axis (multiple of 128)
    # w_ref: (C_out, C_in)
    # b_ref: (C_out, 1)
    # o_ref: (C_out, T)
    acc = jnp.dot(w_ref[...], x_ref[...], preferred_element_type=jnp.float32)
    acc = acc + b_ref[...]                                   # broadcast over lanes
    o_ref[...] = jnp.maximum(acc, 0.0).astype(o_ref.dtype)   # ReLU


def _round_up(x, m):
    return ((x + m - 1) // m) * m


def _vmem_limits():
    """Per-generation VMEM limit and tile-data budget (bytes)."""
    try:
        cap = int(pltpu.get_tpu_info().vmem_capacity_bytes)
    except Exception:
        cap = 64 * 1024 * 1024  # conservative fallback: v7x per-TC VMEM
    # ~48 MiB on v7x (64 MiB physical), ~96 MiB on v5e/v6e (128 MiB physical)
    vmem_limit = min(int(cap * 0.75), 100 * 1024 * 1024)
    # Headroom for weights/bias and compiler scratch.
    tile_budget = int(vmem_limit * 0.8)
    return vmem_limit, tile_budget


def _choose_tile_hw(hw, n_batch, c_in, c_out, itemsize, tile_budget):
    """Largest 128-multiple pixel tile whose double-buffered in+out blocks fit
    the VMEM budget, preferring the whole per-batch slab; keeps >= 2 parallel
    grid blocks overall so both v7x TensorCores get work."""
    per_pixel = 2 * (c_in + c_out) * itemsize            # in + out, double-buffered
    t_budget = max(128, (tile_budget // per_pixel) // 128 * 128)
    tile = min(t_budget, _round_up(hw, 128))
    # Guarantee at least 2 parallel blocks (v7x has 2 TensorCores).
    n_tiles = _round_up(hw, tile) // tile
    if n_batch * n_tiles < 2 and tile >= 256:
        tile = max(128, (tile // 2) // 128 * 128)
    return tile


def outconv_pallas(x_nchw, weight, bias):
    """1x1 conv + ReLU matching nn.Conv2d(Cin, Cout, kernel_size=1) + ReLU.

    x_nchw: (N, C_in, H, W) float32
    weight: (C_out, C_in, 1, 1) float32   (PyTorch conv weight layout)
    bias:   (C_out,) float32
    returns (N, C_out, H, W) float32
    """
    N, C_in, H, W = x_nchw.shape
    C_out = weight.shape[0]
    HW = H * W
    itemsize = jnp.dtype(x_nchw.dtype).itemsize

    # Free (contiguous) reshapes only — no transposes.
    x = x_nchw.reshape(N, C_in, HW)            # (N, C_in, HW)
    w_mat = weight.reshape(C_out, C_in)        # (C_out, C_in)
    b_col = bias.reshape(C_out, 1)             # (C_out, 1)

    vmem_limit, tile_budget = _vmem_limits()
    tile_hw = _choose_tile_hw(HW, N, C_in, C_out, itemsize, tile_budget)

    # One cheap pad keeps every block lane-dense (unmasked stores) and bounded.
    HW_pad = _round_up(HW, tile_hw)
    if HW_pad != HW:
        x = jnp.pad(x, ((0, 0), (0, 0), (0, HW_pad - HW)))

    grid = (N, HW_pad // tile_hw)              # both axes parallel (no reduction)

    flops = 2 * N * HW * C_in * C_out
    bytes_accessed = itemsize * (
        N * C_in * HW + N * C_out * HW + w_mat.size + b_col.size)

    out = pl.pallas_call(
        _outconv_kernel,
        out_shape=jax.ShapeDtypeStruct((N, C_out, HW_pad), x_nchw.dtype),
        grid_spec=pltpu.PrefetchScalarGridSpec(
            num_scalar_prefetch=0,
            grid=grid,
            in_specs=[
                # Batch dim squeezed; pixels lane-dense on the last axis.
                pl.BlockSpec((None, C_in, tile_hw), lambda n, j: (n, 0, j)),
                # Weight / bias: fetched once (constant index_map).
                pl.BlockSpec((C_out, C_in), lambda n, j: (0, 0)),
                pl.BlockSpec((C_out, 1), lambda n, j: (0, 0)),
            ],
            out_specs=pl.BlockSpec((None, C_out, tile_hw), lambda n, j: (n, 0, j)),
        ),
        compiler_params=pltpu.CompilerParams(
            dimension_semantics=("parallel", "parallel"),
            vmem_limit_bytes=vmem_limit,
        ),
        cost_estimate=pl.CostEstimate(
            flops=flops, transcendentals=0, bytes_accessed=int(bytes_accessed)),
    )(x, w_mat, b_col)

    if HW_pad != HW:
        out = out[:, :, :HW]
    return out.reshape(N, C_out, H, W)


def outconv_ref(x_nchw, weight, bias):
    """Pure-JAX reference matching PyTorch semantics."""
    w_mat = weight.reshape(weight.shape[0], weight.shape[1])   # (C_out, C_in)
    y = jnp.einsum("nchw,oc->nohw", x_nchw, w_mat) + bias[None, :, None, None]
    return jnp.maximum(y, 0.0)


if __name__ == "__main__":
    key = jax.random.PRNGKey(0)
    k_x, k_w, k_b = jax.random.split(key, 3)

    # Small shapes consistent with the module: N=2, C_in=4, C_out=8, H=W=16
    N, C_in, C_out, H, W = 2, 4, 8, 16, 16

    x = jax.random.normal(k_x, (N, C_in, H, W), dtype=jnp.float32)
    # Deterministic parameter init (synthetic; shapes match nn.Conv2d(4, 8, 1))
    weight = jax.random.normal(k_w, (C_out, C_in, 1, 1), dtype=jnp.float32) * 0.1
    bias = jax.random.normal(k_b, (C_out,), dtype=jnp.float32) * 0.1

    out = outconv_pallas(x, weight, bias)
    out = jax.block_until_ready(out)

    ref = outconv_ref(x, weight, bias)
    assert out.shape == (N, C_out, H, W), out.shape
    assert jnp.allclose(out, ref, atol=1e-5, rtol=1e-5), "mismatch vs reference"

    print("KERNEL_OK")
</pallas_src>

<mosaic_0001>
module attributes {stable_mosaic.version = 11 : i64} {
  func.func @_outconv_kernel(%arg0: i32, %arg1: i32, %arg2: memref<1x4x256xf32, #tpu.memory_space<vmem>>, %arg3: memref<8x4xf32, #tpu.memory_space<vmem>>, %arg4: memref<8x1xf32, #tpu.memory_space<vmem>>, %arg5: memref<1x8x256xf32, #tpu.memory_space<vmem>>) attributes {dimension_semantics = [#tpu.dimension_semantics<parallel>, #tpu.dimension_semantics<parallel>], iteration_bounds = array<i64: 2, 1>, scalar_prefetch = 0 : i64, scratch_operands = 0 : i64, tpu.core_type = #tpu.core_type<tc>, window_params = [{transform_indices = @transform_0, window_bounds = array<i64: 1, 4, 256>}, {pipeline_mode = #tpu.pipeline_mode<synchronous>, transform_indices = @transform_1, window_bounds = array<i64: 8, 4>}, {pipeline_mode = #tpu.pipeline_mode<synchronous>, transform_indices = @transform_2, window_bounds = array<i64: 8, 1>}, {transform_indices = @transform_3, window_bounds = array<i64: 1, 8, 256>}]} {
    %c0 = arith.constant 0 : index
    %c0_0 = arith.constant 0 : index
    %0 = vector.load %arg3[%c0, %c0_0] : memref<8x4xf32, #tpu.memory_space<vmem>>, vector<8x4xf32>
    %c0_1 = arith.constant 0 : index
    %c0_2 = arith.constant 0 : index
    %c0_3 = arith.constant 0 : index
    %1 = vector.load %arg2[%c0_1, %c0_2, %c0_3] : memref<1x4x256xf32, #tpu.memory_space<vmem>>, vector<1x4x256xf32>
    %2 = vector.shape_cast %1 : vector<1x4x256xf32> to vector<4x256xf32>
    %cst = arith.constant dense<0.000000e+00> : vector<8x256xf32>
    %3 = tpu.matmul %0, %2, %cst {dimension_numbers = #tpu.dot_dimension_numbers<[1], [0], [0], [1], [0, 0, 1, 1], [], []>} : vector<8x4xf32>, vector<4x256xf32>, vector<8x256xf32> -> vector<8x256xf32>
    %c0_4 = arith.constant 0 : index
    %c0_5 = arith.constant 0 : index
    %4 = vector.load %arg4[%c0_4, %c0_5] : memref<8x1xf32, #tpu.memory_space<vmem>>, vector<8x1xf32>
    %5 = vector.broadcast %4 : vector<8x1xf32> to vector<8x256xf32>
    %6 = arith.addf %3, %5 : vector<8x256xf32>
    %cst_6 = arith.constant 0.000000e+00 : f32
    %7 = vector.broadcast %cst_6 : f32 to vector<8x256xf32>
    %8 = arith.maximumf %6, %7 : vector<8x256xf32>
    %c0_7 = arith.constant 0 : index
    %c0_8 = arith.constant 0 : index
    %c0_9 = arith.constant 0 : index
    %9 = vector.load %arg5[%c0_7, %c0_8, %c0_9] : memref<1x8x256xf32, #tpu.memory_space<vmem>>, vector<1x8x256xf32>
    %10 = vector.shape_cast %9 : vector<1x8x256xf32> to vector<8x256xf32>
    %11 = vector.shape_cast %8 : vector<8x256xf32> to vector<1x8x256xf32>
    tpu.vector_store %arg5[%c0_7, %c0_8, %c0_9], %11 {strides = array<i32>} : memref<1x8x256xf32, #tpu.memory_space<vmem>>, vector<1x8x256xf32>,
    return
  }
  func.func @transform_0(%arg0: i32, %arg1: i32) -> (i32, i32, i32) {
    %c0_i32 = arith.constant 0 : i32
    %c0_i32_0 = arith.constant 0 : i32
    return %arg0, %c0_i32, %arg1 : i32, i32, i32
  }
  func.func @transform_1(%arg0: i32, %arg1: i32) -> (i32, i32) {
    %c0_i32 = arith.constant 0 : i32
    %c0_i32_0 = arith.constant 0 : i32
    %c0_i32_1 = arith.constant 0 : i32
    return %c0_i32, %c0_i32_0 : i32, i32
  }
  func.func @transform_2(%arg0: i32, %arg1: i32) -> (i32, i32) {
    %c0_i32 = arith.constant 0 : i32
    %c0_i32_0 = arith.constant 0 : i32
    %c0_i32_1 = arith.constant 0 : i32
    return %c0_i32, %c0_i32_0 : i32, i32
  }
  func.func @transform_3(%arg0: i32, %arg1: i32) -> (i32, i32, i32) {
    %c0_i32 = arith.constant 0 : i32
    %c0_i32_0 = arith.constant 0 : i32
    return %arg0, %c0_i32, %arg1 : i32, i32, i32
  }
}

</mosaic_0001>

<bundles_post_ra>
// kernel: tpu_custom_call.1
= control target key start
LH: loop header
LB: loop body
LE: loop exit
PB: predicated region body
PF: predicated region fallthrough
CT: control target
= control target key end

     0   :  { %8 = vsyncpa [#allocation3], 0  ;;  %s640_s0 = inlined_call_operand.vmem [shape: f32[2,4,256], index: 0, kind: input, shape index: {}]   ;;  %s641_s1 = inlined_call_operand.vmem [shape: f32[8,4], index: 1, kind: input, shape index: {}]   ;;  %s642_s2 = inlined_call_operand.vmem [shape: f32[8,1], index: 2, kind: input, shape index: {}]   ;;  %s643_s3 = inlined_call_operand.hbm [shape: f32[2,8,256], index: 3, kind: output, shape index: {}]  }
   0x1   :  { %10 = vsyncpa [#allocation3 + $0x1], 0  ;;  %s537_s12 = smov 0   ;;  %s539_s13 = smov 0  }
   0x2   :  { %s541_s14 = smov 0   ;;  %s543_s15 = smov 0  }
   0x3   :  { %s545_s16 = smov 0   ;;  %s547_s17 = smov 0  }
   0x4 LB: > { %s360_s18 = sadd.s32 4294967295, %s514_s17   ;;  %s361_s19 = sadd.s32 4294967294, %s514_s17   ;;  %s514_s17 = sphi %s547_s17, %s16_s17   ;;  %s510_s16 = sphi %s545_s16, %s650_s16   ;;  %s506_s15 = sphi %s543_s15, %s649_s15   ;;  %s502_s14 = sphi %s541_s14, %s648_s14   ;;  %s498_s13 = sphi %s539_s13, %s647_s13   ;;  %s494_s12 = sphi %s537_s12, %s646_s12  }
   0x5   : > { %s28_s20 = sadd.s32 1, %s510_s16  ;;  %s107_s21 = sadd.s32 1, %s502_s14 }
   0x6   : > { %p30_p0 = scmp.ge.s32.totalorder %s28_s20, 2  ;;  %p117_p1 = scmp.ne.s32.totalorder %s502_s14, %s498_s13 }
   0x7   : > { %p118_p2 = scmp.eq.s32.totalorder %s360_s18, 1  ;;  %p123_p3 = scmp.ne.s32.totalorder %s498_s13, %s494_s12 }
   0x8   : > { %s652_s20 = smov (%p30_p0, %s28_s20), 0  ;;  %p124_p5 = scmp.eq.s32.totalorder %s361_s19, 1 }
   0x9   : > { %p577_p4 = por %p118_p2, %p117_p1  ;;  %s102_s23 = ssub.s32 %s510_s16, %s652_s20 }
   0xa   : > { %p364_p6 = scmp.ge.s32.totalorder %s514_s17, 1  ;;  %p105_p7 = scmp.eq.s32.totalorder %s102_s23, 0 }
   0xb   : > { %p584_p8 = por %p124_p5, %p123_p3  ;;  %p161_p9 = scmp.lt.s32.totalorder %s514_s17, 3 }
   0xc   : > { %s590_s25 = scalar_select %p105_p7, %s502_s14, %s107_s21  }
   0xd   : > { %p162_p10 = pnand %p364_p6, %p161_p9 }
   0xe   : > { %p190_p11 = scmp.lt.s32.totalorder (!%p162_p10), %s506_s15, 1  ;;  %s186_s8 = sand.u32 (!%p162_p10), 1, %s498_s13  }
   0xf   : > { %165 = sbr.rel (%p162_p10) target bundleno = 168 (0xa8), region = 32  ;;  %s365_s9 = sshll.u32 (!%p162_p10), %s186_s8, 4 }
  0x10   : > { %s378_s10 = sshll.u32 (!%p162_p10), %s506_s15, 4  ;;  %s188_s21 = scalar_lea.vmem (!%p162_p10), [#allocation2], %s365_s9 }
  0x11   : > { %s279_s19 = scalar_lea.hbm (!%p162_p10), %s643_s3, %s378_s10  ;;  %s281_s23 = sshll.u32 (!%p162_p10), %s188_s21, 4  ;;  %s282_s23 = int_to_ptr.vmem [resolvable:$true] %s281_s23 }
  0x12   : > { %s283_s26 = sshll.u32 (!%p162_p10), %s279_s19, 4  ;;  %s456_s4 = scalar_lea.hbm (!%p162_p10), %s643_s3, 32  ;;  %s284_s26 = int_to_ptr.hbm [resolvable:$true] %s283_s26 }
  0x13   : > { %s450_s27 = sshra.s32 (!%p162_p10), %s284_s26, 4  ;;  %s451_s27 = int_to_ptr.hbm [resolvable:$true] %s450_s27 }
  0x14   : > { %v202_v0 = vld [vmem:[%s642_s2] sm:$0xff]  ;;  %v516_v1 = vmov 0   ;;  %s191_s28 = scalar_select %p190_p11, %s506_s15, 1  ;;  %vm216_vm0 = vcmask 1043456   ;;  %vm212_vm1 = vcmask 31744  }
  0x15   : > { %435 = vset.pattern.permute.xlu0 %v516_v1  ;;  %v200_v3 = vld [vmem:[%s641_s1] sm:$0xff]  ;;  %s266_s15 = scalar_lea.sflag [#allocation3], %s186_s8  ;;  %p457_p1 = scmp.lt.s32.totalorder %s451_s27, %s643_s3 }
  0x16   : > { %205 = vperm.xlu0 %435, %v202_v0   ;;  %s377_s29 = sshll.u32 %s191_s28, 3  ;;  %s452_s28 = scalar_lea.hbm %s451_s27, 16 }
  0x17   : > { %s197_s5 = scalar_lea.vmem %s640_s0, %s377_s29  ;;  %p453_p12 = scmp.ne.s32.totalorder %s451_s27, %s452_s28 }
  0x18   : > { %v201_v2 = vld [vmem:[%s197_s5] sm:$0xff]  ;;  %p458_p2 = scmp.lt.s32.totalorder %s456_s4, %s452_s28 }
  0x19   : > { %209 = vst [vmem:[#allocation1] ss:$2 sm:$0xff] %v201_v2  ;;  %p454_p13 = pnand %p453_p12, %p577_p4 }
  0x1a   : > { %p459_p3 = por %p458_p2, %p457_p1 }
  0x1b   : > { %p455_p0 = pneg %p454_p13 }
  0x1d   : > { %p460_p5 = pnand %p459_p3, %p455_p0 }
  0x20   : > { %v210_v4 = vld.sshfl [vmem:[#allocation1] sm:$0xff pattern:$0x75316420]  ;;  %v211_v5 = vld.sshfl [vmem:[#allocation1 + $0x8] sm:$0xff pattern:$0x75316420] }
  0x21   : > { %368 = vmatpush.msk.msra.mxu0 %vm216_vm0, %v210_v4  ;;  %370 = vmatpush.msk.msra.mxu1 %vm216_vm0, %v211_v5 }
  0x22   : > { %369 = vmatmul.msk.f32.vlgmr.msra.gmra.mxu0 %vm212_vm1, %v200_v3  ;;  %371 = vmatmul.msk.f32.vlgmr.msra.gmra.mxu1 %vm212_vm1, %v200_v3 }
  0x88   : > { %v206_v6 = vpop.permute.xlu0 %205 }
  0x9f   : > { %v238_v7 = vpop.f32.mrf.mxu0  ;;  %v258_v8 = vpop.f32.mrf.mxu1 }
  0xa0   : > { %v239_v9 = vadd.f32 %v238_v7, %v206_v6  ;;  %v259_v10 = vadd.f32 %v258_v8, %v206_v6 }
  0xa2   : > { %v261_v11 = vmax.f32 %v239_v9, 0.0  ;;  %v262_v12 = vmax.f32 %v259_v10, 0.0 }
  0xa4   : > { %263 = vst [vmem:[%s188_s21] sm:$0xff] %v261_v11 }
  0xa5   : > { %264 = vst [vmem:[%s188_s21 + $0x8] sm:$0xff] %v262_v12 }
  0xa6   : > { %463 = shalt.err (!%p460_p5)
}
  0xa7   : > { %379 = dma.vmem_to_hbm [thread:$0]  (%p577_p4), %s282_s23, 256, %s284_s26, %s266_s15  }
  0xa8 PF: > { %p385_p6 = scmp.ge.s32.totalorder %s514_s17, 2  ;;  %s295_s7 = sand.u32 1, %s494_s12  }
  0xa9   : > { %s296_s8 = scalar_lea.sflag [#allocation3], %s295_s7 }
  0xaa   : > { %p382_p7 = pnand %p385_p6, %p584_p8 }
  0xac   : > { %p383_p9 = pneg %p382_p7 }
  0xae   : > { %489 = dma.done.wait (%p383_p9), %s296_s8, 256  }
  0xaf   : > { %491 = vsyncadd (%p383_p9), %s296_s8, 4294967040  ;;  %s16_s17 = sadd.s32 1, %s514_s17   ;;  %s646_s12 = smov %s498_s13 }
  0xb0   : > { %p13_p10 = scmp.ge.s32.totalorder %s16_s17, 4   ;;  %s647_s13 = smov %s502_s14 }
  0xb1   : > { %s648_s14 = smov %s590_s25  ;;  %s649_s15 = smov %s510_s16 }
  0xb2   : > { %s650_s16 = smov %s652_s20  ;;  %15 = sbr.rel (!%p13_p10) target bundleno = 4 (0x4), region = 67 }
  0xb7   :  { %302 = vsyncpa [#allocation3], 1 }
  0xb8   :  { %304 = vsyncpa [#allocation3 + $0x1], 1 }

</bundles_post_ra>
